<compile_context>
chip_gen: v7x
topology: tpu7x:2x2x1
jax: 0.10.0
libtpu: 0.0.40
codegen_flags: <defaults>
</compile_context>

<pallas_src>
import functools

import jax
import jax.numpy as jnp
from jax import lax
from jax.experimental import pallas as pl
from jax.experimental.pallas import tpu as pltpu

_LANE = 128
_MIB = 1024 * 1024


def _round_up(n, m):
    return ((n + m - 1) // m) * m


# --------------------------- chip / feature probes ---------------------------
def _chip_info():
    """Returns (vmem_capacity_bytes, prefer_wide_mxu). Conservative on unknowns."""
    kind = ""
    try:
        kind = jax.devices()[0].device_kind.lower()
    except Exception:
        pass
    cap = None
    try:
        c = getattr(pltpu.get_tpu_info(), "vmem_capacity_bytes", None)
        if c:
            cap = int(c)
    except Exception:
        cap = None
    is_v7 = ("v7" in kind) or ("tpu7" in kind) or ("7x" in kind)
    narrow = any(t in kind for t in ("v2", "v3", "v4", "v5"))  # 128-wide MXU parts
    if cap is None:
        cap = 64 * _MIB if is_v7 else 128 * _MIB
    if is_v7:
        cap = min(cap, 64 * _MIB)  # per-TensorCore VMEM on v7x is 64 MiB
    return cap, (not narrow)


def _probe_single_buffering():
    """Check pipeline_mode=pl.Buffered(1) works on this jax/libtpu combination."""
    try:
        def k(x_ref, o_ref):
            o_ref[...] = x_ref[...]

        x = jnp.zeros((8, _LANE), jnp.float32)
        out = pl.pallas_call(
            k,
            out_shape=jax.ShapeDtypeStruct((8, _LANE), jnp.float32),
            grid=(1,),
            in_specs=[pl.BlockSpec((8, _LANE), lambda i: (0, 0),
                                   pipeline_mode=pl.Buffered(1))],
            out_specs=pl.BlockSpec((8, _LANE), lambda i: (0, 0)),
        )(x)
        jax.block_until_ready(out)
        return True
    except Exception:
        return False


# ------------------------------- Pallas kernel -------------------------------
def _conv_kernel(*refs, ksize, dilation, l_out, relu, bb, has_shift, has_acc):
    """One (cout-tile, cin-tile) grid step of dilated Conv1d + BN affine (+ReLU).

    refs = (x, [x_shift,] w, scale, shift, out, [acc]) where
      x        (bb, lp,   cin_tile) bf16  resident (single-buffered when unsplit)
      x_shift  (bb, lp-4, cin_tile) bf16  x shifted by 4 rows (8-aligned odd taps)
      w        (ksize, cin_tile, tco) bf16
      scale/shift (1, tco) f32  (folded conv bias + BatchNorm affine)
      out      (bb, l_out, tco)
      acc      (bb, l_out, tco) f32 scratch (only when the Cin axis is split)
    """
    idx = 0
    x_ref = refs[idx]; idx += 1
    xs_ref = None
    if has_shift:
        xs_ref = refs[idx]; idx += 1
    w_ref, scale_ref, shift_ref, o_ref = refs[idx:idx + 4]
    acc_ref = refs[idx + 4] if has_acc else None

    def taps(b):
        # Two serial accumulation chains (even/odd taps) -> shorter VALU dep chain
        # behind the MXU result pops, while keeping few live f32 temporaries.
        chains = [None, None]
        for k in range(ksize):
            off = k * dilation
            if has_shift and (off % 8) != 0:
                src, start = xs_ref, off - (off % 8)  # shifted copy -> 8-aligned start
            else:
                src, start = x_ref, off
            d = jnp.dot(src[b, pl.ds(start, l_out), :], w_ref[k],
                        preferred_element_type=jnp.float32)
            g = k & 1
            chains[g] = d if chains[g] is None else chains[g] + d
        return chains[0] if chains[1] is None else chains[0] + chains[1]

    def epilogue(acc2d):
        y = acc2d * scale_ref[...] + shift_ref[...]
        if relu:
            y = jnp.maximum(y, 0.0)
        return y.astype(o_ref.dtype)

    if has_acc:
        j = pl.program_id(1)

        @pl.when(j == 0)
        def _():
            acc_ref[...] = jnp.zeros_like(acc_ref)

        for b in range(bb):
            acc_ref[b] = acc_ref[b] + taps(b)

        @pl.when(j == pl.num_programs(1) - 1)
        def _():
            for b in range(bb):
                o_ref[b] = epilogue(acc_ref[b])
    else:
        for b in range(bb):
            o_ref[b] = epilogue(taps(b))


def _conv_layer(x_main, x_shift, w, scale, shift, cfg, vmem_limit, single_buf):
    """Dilated Conv1d + folded BN affine + optional ReLU for one batch chunk."""
    bb, lp, cin_p = x_main.shape
    tco, s, cout_p, l_out = cfg["tco"], cfg["s"], cfg["cout_p"], cfg["l_out"]
    k_eff = w.shape[0]
    cin_tile = cin_p // s
    has_shift = x_shift is not None
    has_acc = s > 1

    # Constant-index resident inputs: no double buffering needed.
    x_mode = {"pipeline_mode": pl.Buffered(1)} if (s == 1 and single_buf) else {}
    in_specs = [pl.BlockSpec((bb, lp, cin_tile), lambda i, j: (0, 0, j), **x_mode)]
    operands = [x_main]
    if has_shift:
        lps = x_shift.shape[1]
        in_specs.append(pl.BlockSpec((bb, lps, cin_tile), lambda i, j: (0, 0, j),
                                     **x_mode))
        operands.append(x_shift)
    in_specs += [
        pl.BlockSpec((k_eff, cin_tile, tco), lambda i, j: (0, j, i)),
        pl.BlockSpec((1, tco), lambda i, j: (0, i)),
        pl.BlockSpec((1, tco), lambda i, j: (0, i)),
    ]
    operands += [w, scale, shift]
    scratch = [pltpu.VMEM((bb, l_out, tco), jnp.float32)] if has_acc else []

    kernel = functools.partial(
        _conv_kernel, ksize=k_eff, dilation=cfg["d_eff"], l_out=l_out,
        relu=cfg["relu"], bb=bb, has_shift=has_shift, has_acc=has_acc)

    return pl.pallas_call(
        kernel,
        out_shape=jax.ShapeDtypeStruct((bb, l_out, cout_p), cfg["out_dtype"]),
        grid_spec=pltpu.PrefetchScalarGridSpec(
            num_scalar_prefetch=0,
            grid=(cout_p // tco, s),   # (cout tiles: parallel, cin tiles: reduction)
            in_specs=in_specs,
            out_specs=pl.BlockSpec((bb, l_out, tco), lambda i, j: (0, 0, i)),
            scratch_shapes=scratch,
        ),
        compiler_params=pltpu.CompilerParams(
            dimension_semantics=("parallel", "arbitrary"),
            vmem_limit_bytes=vmem_limit,
        ),
    )(*operands)


# ------------------------- static per-layer planning ------------------------
_LAYERS = (
    dict(cin=4,    cout=640,  k=8, dilation=1, padding=3,  relu=True),
    dict(cin=640,  cout=640,  k=8, dilation=1, padding=4,  relu=True),
    dict(cin=640,  cout=4008, k=8, dilation=4, padding=14, relu=True),
    dict(cin=4008, cout=4008, k=8, dilation=4, padding=14, relu=False),
)


def _estimate_vmem(bb, lp, lp_shift, cin_tile, k_eff, tco, l_out, out_isize, s,
                   single_buf):
    x_bufs = 1 if (s == 1 and single_buf) else 2
    x_b = x_bufs * bb * (lp + lp_shift) * cin_tile * 2   # bf16 inputs
    w_b = 2 * k_eff * cin_tile * tco * 2                 # bf16 weight tile (dbuf)
    o_b = 2 * bb * l_out * tco * out_isize               # output tile (dbuf)
    acc_b = bb * l_out * tco * 4 if s > 1 else 0         # f32 acc scratch
    tmp_b = 2 * bb * l_out * tco * 4                     # f32 matmul temporaries
    return x_b + w_b + o_b + acc_b + tmp_b + 8 * tco * 4


def _plan_layers(l_in, bb, budget, prefer_wide, single_buf):
    tco_prefs = (256, 128) if prefer_wide else (128,)
    layers, ok, l, prev_cout_p = [], True, l_in, None
    for idx, cfg in enumerate(_LAYERS):
        k, d, p = cfg["k"], cfg["dilation"], cfg["padding"]
        l_out = l + 2 * p - d * (k - 1)
        im2col = idx < 2                    # dilation=1 layers get im2col'd
        if im2col:
            cin_per_tap_p = prev_cout_p if prev_cout_p is not None else cfg["cin"]
            cin_p = _round_up(k * cin_per_tap_p, _LANE)
            k_eff, d_eff, lp, lp_shift, has_shift = 1, 1, l_out, 0, False
        else:
            cin_per_tap_p = prev_cout_p
            cin_p = cin_per_tap_p
            k_eff, d_eff = k, d
            lp = l + 2 * p
            # dilation=4 taps have offsets {0,4} mod 8 -> one extra copy shifted by 4.
            has_shift = any((kk * d) % 8 for kk in range(k))
            lp_shift = (lp - 4) if has_shift else 0
        chosen = None
        for tco in tco_prefs:
            cout_p = _round_up(cfg["cout"], tco)
            for s in (1, 2, 4):
                if cin_p % (s * _LANE):
                    continue
                if _estimate_vmem(bb, lp, lp_shift, cin_p // s, k_eff, tco, l_out,
                                  2, s, single_buf) <= budget:
                    chosen = (tco, cout_p, s)
                    break
            if chosen:
                break
        if chosen is None:                  # best-effort fallback
            ok = False
            tco = 128
            cout_p = _round_up(cfg["cout"], tco)
            s = max(x for x in (1, 2, 4, 8) if cin_p % (x * _LANE) == 0)
            chosen = (tco, cout_p, s)
        tco, cout_p, s = chosen
        layers.append(dict(
            im2col=im2col, k=k, k_eff=k_eff, d_eff=d_eff, dilation=d, padding=p,
            relu=cfg["relu"], cout=cfg["cout"], cout_p=cout_p, tco=tco, s=s,
            cin_per_tap_p=cin_per_tap_p, cin_p=cin_p, lp=lp, lp_shift=lp_shift,
            l_out=l_out, has_shift=has_shift, out_dtype=jnp.bfloat16))
        prev_cout_p = cout_p
        l = l_out
    return layers, ok


def build_plan(l_in, batch, vmem_limit, prefer_wide, single_buf):
    budget = max(vmem_limit - 8 * _MIB, 8 * _MIB)
    bb = max(min(batch, 2), 1)
    while bb > 1:
        layers, ok = _plan_layers(l_in, bb, budget, prefer_wide, single_buf)
        if ok:
            return dict(bb=bb, layers=layers, single_buf=single_buf)
        bb -= 1
    layers, _ = _plan_layers(l_in, 1, budget, prefer_wide, single_buf)
    return dict(bb=1, layers=layers, single_buf=single_buf)


# ------------------------------ parameters ----------------------------------
def init_params(key):
    def conv_init(k, cout, cin, ksize):
        kw, kb = jax.random.split(k)
        fan_in = cin * ksize
        w = jax.random.normal(kw, (cout, cin, ksize), jnp.float32) / jnp.sqrt(
            jnp.float32(fan_in))
        b = jax.random.normal(kb, (cout,), jnp.float32) * 0.01
        return w, b

    keys = jax.random.split(key, 4)
    params = {
        "conv1": conv_init(keys[0], 640, 4, 8),
        "conv2": conv_init(keys[1], 640, 640, 8),
        "conv3": conv_init(keys[2], 4008, 640, 8),
        "conv4": conv_init(keys[3], 4008, 4008, 8),
    }

    eps = 1e-5

    def bn_affine(c):
        gamma = jnp.ones((c,), jnp.float32)
        beta = jnp.zeros((c,), jnp.float32)
        mean = jnp.zeros((c,), jnp.float32)
        var = jnp.ones((c,), jnp.float32)
        sc = gamma / jnp.sqrt(var + eps)
        sh = beta - mean * sc
        return sc, sh

    params["bn1"] = bn_affine(640)
    params["bn2"] = bn_affine(640)
    params["bn3"] = bn_affine(4008)
    return params


def preprocess_params(params, plan):
    """One-time: fold conv bias + BN affine, transpose/pad weights, cast to bf16."""
    names = ("conv1", "conv2", "conv3", "conv4")
    bns = ("bn1", "bn2", "bn3", None)
    prepped = []
    for cfg, name, bn in zip(plan["layers"], names, bns):
        w, b = params[name]                         # (Cout, Cin, K) PyTorch layout
        cout, cin, k = w.shape
        if bn is not None:
            sc, sh = params[bn]
        else:
            sc = jnp.ones((cout,), jnp.float32)
            sh = jnp.zeros((cout,), jnp.float32)
        eff_scale = sc
        eff_shift = b * sc + sh                     # BN(conv + b) folded affine

        w_kio = jnp.transpose(w, (2, 1, 0))         # (K, Cin, Cout)
        # Pad the per-tap Cin to the previous layer's padded channel width
        # (those activation channels are exactly zero, so this is exact).
        w_kio = jnp.pad(w_kio, ((0, 0), (0, cfg["cin_per_tap_p"] - cin), (0, 0)))
        if cfg["im2col"]:
            w_kio = w_kio.reshape(1, k * cfg["cin_per_tap_p"], cout)
        ci = w_kio.shape[1]
        w_kio = jnp.pad(w_kio, ((0, 0), (0, cfg["cin_p"] - ci),
                                (0, cfg["cout_p"] - cout)))
        scale = jnp.pad(eff_scale, (0, cfg["cout_p"] - cout)).reshape(1, -1)
        shift = jnp.pad(eff_shift, (0, cfg["cout_p"] - cout)).reshape(1, -1)
        prepped.append(dict(w=w_kio.astype(jnp.bfloat16), scale=scale, shift=shift))
    return prepped


# -------------------------------- forward -----------------------------------
def demo_multi_forward(prepped, x, plan, vmem_limit):
    """x: (B, 4, 1000) NCW float32, matching the PyTorch Conv1d input."""
    B = x.shape[0]
    bb = plan["bb"]
    single_buf = plan["single_buf"]
    layers = plan["layers"]
    pad_b = (-B) % bb
    if pad_b:
        x = jnp.concatenate([x, jnp.zeros((pad_b,) + x.shape[1:], x.dtype)], axis=0)

    chunks = []
    for c0 in range(0, x.shape[0], bb):
        h = jnp.transpose(x[c0:c0 + bb], (0, 2, 1)).astype(jnp.bfloat16)  # (bb, L, C)
        for li, cfg in enumerate(layers):
            prm = prepped[li]
            p, d, k = cfg["padding"], cfg["dilation"], cfg["k"]
            hp = jnp.pad(h, ((0, 0), (p, p), (0, 0)))
            if cfg["im2col"]:
                cols = jnp.concatenate(
                    [hp[:, kk * d:kk * d + cfg["l_out"], :] for kk in range(k)],
                    axis=2)
                pad_c = cfg["cin_p"] - cols.shape[2]
                if pad_c:
                    cols = jnp.pad(cols, ((0, 0), (0, 0), (0, pad_c)))
                x_main, x_shift = cols, None
            else:
                x_main = hp
                x_shift = (hp[:, 4:4 + cfg["lp_shift"], :]
                           if cfg["has_shift"] else None)
            h = _conv_layer(x_main, x_shift, prm["w"], prm["scale"], prm["shift"],
                            cfg, vmem_limit, single_buf)
        # (bb, 1000, cout_p) -> NCW, drop channel padding once at the very end.
        chunks.append(jnp.transpose(h, (0, 2, 1))[:, :layers[-1]["cout"], :])
    layer_two = jnp.concatenate(chunks, axis=0)[:B]          # (B, 4008, 1000)
    return layer_two.reshape(B, 1002, 4, 1000).astype(jnp.float32)


# ---- pure-JAX f32 reference (sanity check) ----------------------------------
def _conv1d_ref(x_ncl, w, b, padding, dilation):
    y = lax.conv_general_dilated(
        x_ncl, w, window_strides=(1,), padding=[(padding, padding)],
        rhs_dilation=(dilation,), dimension_numbers=("NCH", "OIH", "NCH"))
    return y + b[None, :, None]


def demo_multi_ref(params, x):
    eps = 1e-5
    bn = lambda h: h / jnp.sqrt(1.0 + eps)   # default-init inference BN
    w, b = params["conv1"]; h = jax.nn.relu(bn(_conv1d_ref(x, w, b, 3, 1)))
    w, b = params["conv2"]; h = jax.nn.relu(bn(_conv1d_ref(h, w, b, 4, 1)))
    w, b = params["conv3"]; h = jax.nn.relu(bn(_conv1d_ref(h, w, b, 14, 4)))
    w, b = params["conv4"]; h = _conv1d_ref(h, w, b, 14, 4)
    return h.reshape(h.shape[0], 1002, 4, 1000)


if __name__ == "__main__":
    key = jax.random.PRNGKey(0)
    kx, kp = jax.random.split(key)
    params = init_params(kp)
    # L = 1000 is forced by the module's hard-coded reshape (4008*1000 = 1002*4*1000).
    x = jax.random.normal(kx, (2, 4, 1000), jnp.float32)

    vmem_cap, prefer_wide = _chip_info()
    vmem_limit = min(vmem_cap * 3 // 4, 100 * _MIB)
    single_buf = _probe_single_buffering()
    plan = build_plan(x.shape[2], x.shape[0], vmem_limit, prefer_wide, single_buf)

    prep_fn = jax.jit(lambda p: preprocess_params(p, plan))
    prepped = jax.block_until_ready(prep_fn(params))

    fwd = jax.jit(lambda p, xx: demo_multi_forward(p, xx, plan, vmem_limit))
    out = jax.block_until_ready(fwd(prepped, x))
    assert out.shape == (x.shape[0], 1002, 4, 1000), out.shape
    assert bool(jnp.all(jnp.isfinite(out)))

    ref = jax.block_until_ready(demo_multi_ref(params, x))
    norm_err = float(jnp.max(jnp.abs(out - ref)) / (jnp.max(jnp.abs(ref)) + 1e-6))
    assert norm_err < 5e-2, f"normalized max error too large: {norm_err}"

    print("KERNEL_OK")
</pallas_src>

<mosaic_0001>
module attributes {stable_mosaic.version = 11 : i64} {
  func.func @k(%arg0: i32, %arg1: memref<8x128xf32, #tpu.memory_space<vmem>>, %arg2: memref<8x128xf32, #tpu.memory_space<vmem>>) attributes {dimension_semantics = [#tpu.dimension_semantics<arbitrary>], iteration_bounds = array<i64: 1>, scalar_prefetch = 0 : i64, scratch_operands = 0 : i64, tpu.core_type = #tpu.core_type<tc>, window_params = [{pipeline_mode = #tpu.pipeline_mode<synchronous>, transform_indices = @transform_0, window_bounds = array<i64: 8, 128>}, {pipeline_mode = #tpu.pipeline_mode<synchronous>, transform_indices = @transform_1, window_bounds = array<i64: 8, 128>}]} {
    %c0 = arith.constant 0 : index
    %c0_0 = arith.constant 0 : index
    %0 = vector.load %arg1[%c0, %c0_0] : memref<8x128xf32, #tpu.memory_space<vmem>>, vector<8x128xf32>
    %c0_1 = arith.constant 0 : index
    %c0_2 = arith.constant 0 : index
    %1 = vector.load %arg2[%c0_1, %c0_2] : memref<8x128xf32, #tpu.memory_space<vmem>>, vector<8x128xf32>
    tpu.vector_store %arg2[%c0_1, %c0_2], %0 {strides = array<i32>} : memref<8x128xf32, #tpu.memory_space<vmem>>, vector<8x128xf32>,
    return
  }
  func.func @transform_0(%arg0: i32) -> (i32, i32) {
    %c0_i32 = arith.constant 0 : i32
    %c0_i32_0 = arith.constant 0 : i32
    %c0_i32_1 = arith.constant 0 : i32
    return %c0_i32, %c0_i32_0 : i32, i32
  }
  func.func @transform_1(%arg0: i32) -> (i32, i32) {
    %c0_i32 = arith.constant 0 : i32
    %c0_i32_0 = arith.constant 0 : i32
    %c0_i32_1 = arith.constant 0 : i32
    return %c0_i32, %c0_i32_0 : i32, i32
  }
}

</mosaic_0001>

<bundles_post_ra>
// kernel: tpu_custom_call.1
= control target key start
LH: loop header
LB: loop body
LE: loop exit
PB: predicated region body
PF: predicated region fallthrough
CT: control target
= control target key end

     0   :  { %6 = vsyncpa [#allocation3], 0  ;;  %s124_s0 = inlined_call_operand.hbm [shape: f32[8,128], index: 0, kind: input, shape index: {}]   ;;  %s125_s1 = inlined_call_operand.hbm [shape: f32[8,128], index: 1, kind: output, shape index: {}]  }
   0x1   :  { %7 = vsyncpa [#allocation4], 0  ;;  %s88_s6 = smov [#allocation2]   ;;  %s40_s10 = scalar_lea.hbm %s124_s0, 128 }
   0x2   :  { %s14_s7 = sshll.u32 %s88_s6, 4  ;;  %p41_p0 = scmp.ne.s32.totalorder %s124_s0, %s40_s10  ;;  %s15_s7 = int_to_ptr.vmem [resolvable:$true] %s14_s7 }
   0x3   :  { %p44_p1 = scmp.lt.u32.totalorder %s40_s10, %s124_s0 }
   0x5   :  { %p46_p2 = pnand %p44_p1, %p41_p0 }
   0x7   :  { %49 = shalt.err (!%p46_p2)
}
   0x8   :  { %s50_s15 = scalar_lea.vmem %s15_s7, 128  ;;  %p55_p4 = scmp.lt.s32.totalorder %s15_s7, %s15_s7 }
   0x9   :  { %p51_p3 = scmp.ne.s32.totalorder %s15_s7, %s50_s15  ;;  %p56_p5 = scmp.lt.s32.totalorder %s50_s15, %s50_s15 }
   0xb   :  { %p57_p6 = por %p56_p5, %p55_p4 }
   0xd   :  { %p58_p7 = pnand %p57_p6, %p51_p3 }
   0xf   :  { %61 = shalt.err (!%p58_p7)
}
  0x10   :  { %17 = dma.hbm_to_vmem [thread:$0]  %s124_s0, 128, %s15_s7, [#allocation3]  }
  0x11   :  { %84 = dma.done.wait [#allocation3], 128  }
  0x12   :  { %85 = vsyncadd [#allocation3], 4294967168  ;;  %s89_s18 = smov [#allocation5]   ;;  %v21_v0 = vld [vmem:[#allocation2] sm:$0xff] }
  0x13   :  { %s29_s19 = sshll.u32 %s89_s18, 4  ;;  %22 = vst [vmem:[#allocation5] sm:$0xff] %v21_v0  ;;  %s30_s19 = int_to_ptr.vmem [resolvable:$true] %s29_s19 }
  0x14   :  { %s62_s20 = scalar_lea.vmem %s30_s19, 128  ;;  %p67_p9 = scmp.lt.s32.totalorder %s30_s19, %s30_s19 }
  0x15   :  { %p63_p8 = scmp.ne.s32.totalorder %s30_s19, %s62_s20  ;;  %p68_p10 = scmp.lt.s32.totalorder %s62_s20, %s62_s20 }
  0x17   :  { %p69_p11 = por %p68_p10, %p67_p9 }
  0x19   :  { %p70_p12 = pnand %p69_p11, %p63_p8 }
  0x1b   :  { %73 = shalt.err (!%p70_p12)
}
  0x1c   :  { %s74_s23 = scalar_lea.hbm %s125_s1, 128 }
  0x1d   :  { %p75_p13 = scmp.ne.s32.totalorder %s125_s1, %s74_s23  ;;  %p78_p0 = scmp.lt.u32.totalorder %s74_s23, %s125_s1 }
  0x1f   :  { %p80_p1 = pnand %p78_p0, %p75_p13 }
  0x21   :  { %83 = shalt.err (!%p80_p1)
}
  0x22   :  { %32 = dma.vmem_to_hbm [thread:$0]  %s30_s19, 128, %s125_s1, [#allocation4]  }
  0x23   :  { %86 = dma.done.wait [#allocation4], 128  }
  0x24   :  { %87 = vsyncadd [#allocation4], 4294967168 }
  0x25   :  { %36 = vsyncpa [#allocation3], 1 }
  0x26   :  { %37 = vsyncpa [#allocation4], 1 }

</bundles_post_ra>
